<compile_context>
chip_gen: v6e
topology: v6e:2x2x1
jax: 0.10.0
libtpu: 0.0.40
codegen_flags: <defaults>
</compile_context>

<pallas_src>
import functools
import math

import jax
import jax.numpy as jnp
from jax import lax
from jax.experimental import pallas as pl
from jax.experimental.pallas import tpu as pltpu

_LEAK = 0.2


# --------------------------------- fused kernel ---------------------------------

def _generator_block_kernel(
        x_ref, n0_ref, n1_ref, mod_ref, sn_ref,
        convT_ref, bias_ref, rgbw_ref, rgbb_ref, expt_ref, mask_ref,
        x_out_ref, rgb_out_ref,
        *, C, shifts):
    """One batch element per grid step; everything channel-major [C, H*W]."""
    expt = expt_ref[...]                                     # [P, HW] f32 one-hot (patch -> pixel)

    def leaky(v):
        return jnp.where(v >= 0.0, v, _LEAK * v)

    def modulated_conv(i, x_cm):
        # Per-patch (modulation scale || demod sigma) expanded to pixels with one small
        # one-hot matmul ([2C, P] x [P, HW]); exact selection since expt is 0/1 in f32.
        full = jnp.dot(mod_ref[0, i], expt,
                       preferred_element_type=jnp.float32)   # [2C, HW] f32
        scale_full = full[:C, :]                              # [C, HW] input-channel scale
        sigma_full = full[C:, :]                              # [C, HW] output-channel demod
        xm = x_cm * scale_full                                # modulated input, f32
        # 3x3 halo built in registers: 8 static lane rolls (XLU) + border masks;
        # no padded scratch, no tile-crossing window slices.
        taps = []
        for k, sh in enumerate(shifts):
            if sh == 0:
                t = xm
            else:
                t = pltpu.roll(xm, shift=sh, axis=1) * mask_ref[k:k + 1, :]
            taps.append(t.astype(jnp.bfloat16))
        patches = jnp.concatenate(taps, axis=0)               # [9C, HW] bf16 (sublane concat)
        acc = jnp.dot(convT_ref[i], patches,
                      preferred_element_type=jnp.float32)     # [C, HW] f32, lane-dense
        return acc * sigma_full                                # demodulated

    x0 = x_ref[0]                                              # [C, HW] f32
    # StyleBlock 1 / 2 (noise broadcast over channels, bias broadcast over pixels)
    x1 = leaky(modulated_conv(0, x0) + sn_ref[0] * n0_ref[0] + bias_ref[0])
    x2 = leaky(modulated_conv(1, x1) + sn_ref[1] * n1_ref[0] + bias_ref[1])
    x_out_ref[0] = x2                                          # (B, C, HW): lane-dense NCHW store
    # ToRGB: modulated 3x3 conv, then the 1x1 conv computed transposed ([3, HW]).
    y3 = modulated_conv(2, x2)
    rgb = jnp.dot(rgbw_ref[...], y3, preferred_element_type=jnp.float32)  # [3, HW]
    rgb_out_ref[0] = leaky(rgb + rgbb_ref[...])


# --------------------------------- pallas wrapper --------------------------------

def _fused_call(x_cm, n0, n1, mod_t, pk, *, H, W, C, roll_sign):
    B = x_cm.shape[0]
    HW = H * W
    P = mod_t.shape[-1]
    # static lane-roll amounts for the 9 conv taps, (kh, kw) row-major order
    shifts = tuple((-roll_sign * (dh * W + dw)) % HW
                   for dh in (-1, 0, 1) for dw in (-1, 0, 1))
    kern = functools.partial(_generator_block_kernel, C=C, shifts=shifts)

    def bcast(shape):
        zeros = (0,) * len(shape)
        return pl.BlockSpec(shape, lambda b, _z=zeros: _z)

    return pl.pallas_call(
        kern,
        out_shape=(jax.ShapeDtypeStruct((B, C, HW), jnp.float32),
                   jax.ShapeDtypeStruct((B, 3, HW), jnp.float32)),
        grid=(B,),
        in_specs=[
            pl.BlockSpec((1, C, HW), lambda b: (b, 0, 0)),           # x (channel-major)
            pl.BlockSpec((1, 1, HW), lambda b: (b, 0, 0)),           # noise map 0
            pl.BlockSpec((1, 1, HW), lambda b: (b, 0, 0)),           # noise map 1
            pl.BlockSpec((1, 3, 2 * C, P), lambda b: (b, 0, 0, 0)),  # per-patch scale||sigma
            pl.BlockSpec(memory_space=pltpu.MemorySpace.SMEM),       # scale_noise (2,)
            bcast((3, C, 9 * C)),     # transposed im2col 3x3 conv weights (bf16)
            bcast((2, C, 1)),         # style-block biases (column layout)
            bcast((3, C)),            # rgb 1x1 conv weight, transposed
            bcast((3, 1)),            # rgb bias (conv bias + ToRGB bias)
            bcast((P, HW)),           # one-hot patch -> pixel table (f32)
            bcast((9, HW)),           # per-tap border masks (f32)
        ],
        out_specs=(pl.BlockSpec((1, C, HW), lambda b: (b, 0, 0)),
                   pl.BlockSpec((1, 3, HW), lambda b: (b, 0, 0))),
        compiler_params=pltpu.CompilerParams(dimension_semantics=("parallel",)),
    )(x_cm, n0, n1, mod_t, pk["scale_noise"],
      pk["convT"], pk["bias"], pk["rgb_wT"], pk["rgb_b"], pk["expand_t"], pk["masks"])


@functools.partial(jax.jit, static_argnames=("roll_sign",))
def generator_block(x_nchw, w, noise, packed, *, roll_sign=1):
    """Forward of GeneratorBlock. Returns (x, rgb) in NCHW, matching the PyTorch module."""
    B, C, H, W = x_nchw.shape
    HW = H * W
    D = w.shape[-1]

    # channel-major views: pure reshapes of contiguous NCHW buffers, no data movement
    x_cm = x_nchw.reshape(B, C, HW)
    n0 = noise[0].reshape(B, 1, HW)
    n1 = noise[1].reshape(B, 1, HW)

    # Tiny per-batch style math (to_style + patch-query attention + to_scale + demod
    # sigma), batched over (B, 3 stages); only KBs, so wrapper cost is negligible and
    # it removes the softmax / small matmuls from the serialized per-grid-step path.
    s = jnp.einsum("bnd,sde->bsne", w, packed["ts_w"]) + packed["ts_b"][None]
    logits = jnp.einsum("spd,bsnd->bspn", packed["pq"], s) * (1.0 / math.sqrt(D))
    attn = jax.nn.softmax(logits, axis=-1)
    ps = jnp.einsum("bspn,bsnd->bspd", attn, s)
    scale = jnp.einsum("bspd,sdc->bspc", ps, packed["sc_w"]) + packed["sc_b"][None]
    sigma = lax.rsqrt(jnp.einsum("bspc,scd->bspd", scale * scale, packed["wsq"]) + 1e-8)
    mod_t = jnp.swapaxes(jnp.concatenate([scale, sigma], axis=-1), -1, -2)  # (B,3,2C,P)

    x_flat, rgb_flat = _fused_call(x_cm, n0, n1, mod_t, packed,
                                   H=H, W=W, C=C, roll_sign=roll_sign)
    return x_flat.reshape(B, C, H, W), rgb_flat.reshape(B, 3, H, W)


# --------------------------- one-time packing / tables ----------------------------

def _patch_expand_t(H, W, psz):
    """[P, H*W] one-hot table mapping a patch index to its pixels."""
    pw = W // psz
    pix = jnp.arange(H * W)
    idx = (pix // W // psz) * pw + (pix % W) // psz
    return jax.nn.one_hot(idx, (H // psz) * pw, dtype=jnp.float32).T


def _tap_masks(H, W):
    """[9, H*W] validity masks (zero where a 3x3 tap would read across the border)."""
    pix = jnp.arange(H * W)
    hh, ww = pix // W, pix % W
    rows = []
    for dh in (-1, 0, 1):
        for dw in (-1, 0, 1):
            rows.append((hh + dh >= 0) & (hh + dh < H) & (ww + dw >= 0) & (ww + dw < W))
    return jnp.stack(rows).astype(jnp.float32)


def _roll_convention_sign():
    """+1 if pltpu.roll matches jnp.roll (out[i] = x[i - shift]), else -1."""
    def k(x_ref, o_ref):
        o_ref[...] = pltpu.roll(x_ref[...], shift=1, axis=1)
    x = jnp.broadcast_to(jnp.arange(128, dtype=jnp.int32), (8, 128))
    out = pl.pallas_call(k, out_shape=jax.ShapeDtypeStruct((8, 128), jnp.int32))(x)
    return 1 if int(out[0, 1]) == 0 else -1


def pack_generator_block_params(params, size, C, psz):
    """One-time packing of all weights/tables (run OUTSIDE the jitted forward)."""
    H = W = size
    blocks = [params["style_block1"], params["style_block2"], params["to_rgb"]]
    to_rgb = params["to_rgb"]
    return dict(
        ts_w=jnp.stack([p["ts_w"] for p in blocks]),                        # (3,D,D)
        ts_b=jnp.stack([p["ts_b"] for p in blocks]),                        # (3,1,D)
        pq=jnp.stack([p["pq"] for p in blocks]),                            # (3,P,D)
        sc_w=jnp.stack([p["sc_w"] for p in blocks]),                        # (3,D,C)
        sc_b=jnp.stack([p["sc_b"] for p in blocks]),                        # (3,1,C)
        wsq=jnp.stack([jnp.sum(p["conv_w"] * p["conv_w"], axis=0)
                       for p in blocks]),                                   # (3,Cin,Cout)
        convT=jnp.stack([p["conv_w"].reshape(9 * C, C).T for p in blocks]
                        ).astype(jnp.bfloat16),                             # (3,Cout,9Cin)
        bias=jnp.stack([params["style_block1"]["bias"],
                        params["style_block2"]["bias"]]).reshape(2, C, 1),  # (2,C,1)
        rgb_wT=to_rgb["rgb_w"].T,                                           # (3,C)
        rgb_b=(to_rgb["rgb_b"] + to_rgb["bias"]).reshape(3, 1),             # (3,1)
        scale_noise=jnp.concatenate([params["style_block1"]["scale_noise"],
                                     params["style_block2"]["scale_noise"]]),  # (2,)
        expand_t=_patch_expand_t(H, W, psz),                                # (P,HW)
        masks=_tap_masks(H, W),                                             # (9,HW)
    )


# ------------------------------ parameter init --------------------------------

def _eq_linear(key, in_f, out_f, bias_init):
    w = jax.random.normal(key, (out_f, in_f), jnp.float32) * (1.0 / math.sqrt(in_f))
    return w.T, jnp.full((1, out_f), bias_init, jnp.float32)             # stored [in, out]


def _init_style_mod(key, size, C, D, psz):
    P = (size // psz) ** 2
    k1, k2, k3 = jax.random.split(key, 3)
    pq = jax.random.normal(k1, (P, D), jnp.float32) * (1.0 / math.sqrt(D))
    sc_w, sc_b = _eq_linear(k2, D, C, 1.0)
    conv = jax.random.normal(k3, (C, C, 3, 3), jnp.float32) * (1.0 / math.sqrt(C * 9))
    conv_w = jnp.transpose(conv, (2, 3, 1, 0)).reshape(9, C, C)          # [kh*kw, Cin, Cout]
    return dict(pq=pq, sc_w=sc_w, sc_b=sc_b, conv_w=conv_w)


def _init_style_block(key, size, C, D, psz):
    k1, k2 = jax.random.split(key, 2)
    ts_w, ts_b = _eq_linear(k1, D, D, 1.0)
    p = _init_style_mod(k2, size, C, D, psz)
    p.update(ts_w=ts_w, ts_b=ts_b,
             scale_noise=jnp.zeros((1,), jnp.float32),                   # nn.Parameter(zeros(1))
             bias=jnp.zeros((1, C), jnp.float32))                        # nn.Parameter(zeros(C))
    return p


def _init_to_rgb(key, size, C, D, psz):
    k1, k2, k3 = jax.random.split(key, 3)
    ts_w, ts_b = _eq_linear(k1, D, D, 1.0)
    p = _init_style_mod(k2, size, C, D, psz)
    rgb = jax.random.normal(k3, (3, C, 1, 1), jnp.float32) * (1.0 / math.sqrt(C))
    p.update(ts_w=ts_w, ts_b=ts_b,
             rgb_w=jnp.transpose(rgb[:, :, 0, 0], (1, 0)),               # [C, 3]
             rgb_b=jnp.zeros((1, 3), jnp.float32),
             bias=jnp.zeros((1, 3), jnp.float32))
    return p


def init_generator_block(key, size, C, D, psz):
    k1, k2, k3 = jax.random.split(key, 3)
    return dict(style_block1=_init_style_block(k1, size, C, D, psz),
                style_block2=_init_style_block(k2, size, C, D, psz),
                to_rgb=_init_to_rgb(k3, size, C, D, psz))


# ------------------------------ pure-JAX reference --------------------------------

def _reference_forward(x, w, noise, params, psz):
    """All-f32 reference of the same reconstruction (no Pallas, no bf16)."""
    B, C, H, W = x.shape
    D = w.shape[-1]
    expand = _patch_expand_t(H, W, psz).T                                # [HW, P]

    def leaky(v):
        return jnp.where(v >= 0.0, v, _LEAK * v)

    def style_scale(p, wv):
        s = wv @ p["ts_w"] + p["ts_b"]
        attn = jax.nn.softmax((p["pq"] @ s.T) / math.sqrt(D), axis=-1)
        return (attn @ s) @ p["sc_w"] + p["sc_b"]                        # [P, C]

    def mod_conv(p, xb, wv):
        scale = style_scale(p, wv)                                       # [P, C]
        scale_full = expand @ scale                                      # [HW, C]
        xm = xb * scale_full.reshape(H, W, C).transpose(2, 0, 1)
        wsq = jnp.sum(p["conv_w"] ** 2, axis=0)                          # [Cin, Cout]
        sigma = lax.rsqrt(scale_full ** 2 @ wsq + 1e-8)                  # [HW, Cout]
        kern = p["conv_w"].reshape(3, 3, C, C)                           # HWIO
        y = lax.conv_general_dilated(xm[None], kern, (1, 1), "SAME",
                                     dimension_numbers=("NCHW", "HWIO", "NCHW"))[0]
        return y * sigma.reshape(H, W, C).transpose(2, 0, 1)

    p1, p2, p3 = params["style_block1"], params["style_block2"], params["to_rgb"]
    xs, rgbs = [], []
    for b in range(B):
        wv = w[b]
        h1 = leaky(mod_conv(p1, x[b], wv)
                   + p1["scale_noise"][0] * noise[0][b] + p1["bias"][0][:, None, None])
        h2 = leaky(mod_conv(p2, h1, wv)
                   + p2["scale_noise"][0] * noise[1][b] + p2["bias"][0][:, None, None])
        y3 = mod_conv(p3, h2, wv)
        rgb = (jnp.einsum("chw,ct->thw", y3, p3["rgb_w"])
               + (p3["rgb_b"] + p3["bias"]).reshape(3)[:, None, None])
        xs.append(h2)
        rgbs.append(leaky(rgb))
    return jnp.stack(xs), jnp.stack(rgbs)


# ----------------------------------- main --------------------------------------

if __name__ == "__main__":
    B, size, C, N, D, psz = 2, 16, 32, 4, 32, 4   # batch, H=W, content_dim, style_num, style_dim, patch
    H = W = size

    key = jax.random.PRNGKey(0)
    kx, kw, kn0, kn1, kp = jax.random.split(key, 5)
    x = jax.random.normal(kx, (B, C, H, W), jnp.float32)                 # NCHW like the PyTorch module
    w = jax.random.normal(kw, (B, N, D), jnp.float32)
    noise0 = jax.random.normal(kn0, (B, 1, H, W), jnp.float32)
    noise1 = jax.random.normal(kn1, (B, 1, H, W), jnp.float32)

    params = init_generator_block(kp, size, C, D, psz)
    packed = pack_generator_block_params(params, size, C, psz)           # one-time, outside jit
    roll_sign = _roll_convention_sign()                                  # one-time guard

    x_out, rgb = generator_block(x, w, (noise0, noise1), packed, roll_sign=roll_sign)
    jax.block_until_ready((x_out, rgb))

    assert x_out.shape == (B, C, H, W), x_out.shape
    assert rgb.shape == (B, 3, H, W), rgb.shape
    assert bool(jnp.isfinite(x_out).all()) and bool(jnp.isfinite(rgb).all())

    # loose sanity check vs. an all-f32 pure-JAX reference (the kernel conv runs in bf16)
    x_want, rgb_want = _reference_forward(x, w, (noise0, noise1), params, psz)
    for got, ref in ((x_out, x_want), (rgb, rgb_want)):
        rel = float(jnp.linalg.norm(got - ref) / (jnp.linalg.norm(ref) + 1e-6))
        mad = float(jnp.max(jnp.abs(got - ref)))
        assert rel < 0.25 and mad < 1.0, (rel, mad)

    print("KERNEL_OK")
</pallas_src>

<mosaic_0001>
module attributes {stable_mosaic.version = 11 : i64} {
  func.func @k(%arg0: memref<8x128xi32, #tpu.memory_space<vmem>>, %arg1: memref<8x128xi32, #tpu.memory_space<vmem>>) attributes {dimension_semantics = [], scalar_prefetch = 0 : i64, scratch_operands = 0 : i64, tpu.core_type = #tpu.core_type<tc>} {
    %c0 = arith.constant 0 : index
    %c0_0 = arith.constant 0 : index
    %0 = vector.load %arg0[%c0, %c0_0] : memref<8x128xi32, #tpu.memory_space<vmem>>, vector<8x128xi32>
    %c1_i32 = arith.constant 1 : i32
    %1 = tpu.dynamic_rotate %0 by %c1_i32 dim 1 : vector<8x128xi32>, i32 -> vector<8x128xi32>
    %c0_1 = arith.constant 0 : index
    %c0_2 = arith.constant 0 : index
    %2 = vector.load %arg1[%c0_1, %c0_2] : memref<8x128xi32, #tpu.memory_space<vmem>>, vector<8x128xi32>
    tpu.vector_store %arg1[%c0_1, %c0_2], %1 {strides = array<i32>} : memref<8x128xi32, #tpu.memory_space<vmem>>, vector<8x128xi32>,
    return
  }
}

</mosaic_0001>

<bundles_post_ra>
// kernel: tpu_custom_call.1
= control target key start
LH: loop header
LB: loop body
LE: loop exit
PB: predicated region body
PF: predicated region fallthrough
CT: control target
= control target key end

     0   :  { %6 = vsyncpa [#allocation3], 0  ;;  %s106_s0 = inlined_call_operand.hbm [shape: s32[8,128], index: 0, kind: input, shape index: {}]   ;;  %s107_s1 = inlined_call_operand.hbm [shape: s32[8,128], index: 1, kind: output, shape index: {}]  }
   0x1   :  { %7 = vsyncpa [#allocation4], 0  ;;  %s87_s6 = smov [#allocation2]  }
   0x2   :  { %s14_s7 = sshll.u32 %s87_s6, 4  ;;  %s15_s7 = int_to_ptr.vmem [resolvable:$true] %s14_s7 }
   0x3   :  { %s51_s8 = scalar_lea.vmem %s15_s7, 128  ;;  %p56_p1 = scmp.lt.s32.totalorder %s15_s7, %s15_s7 }
   0x4   :  { %p52_p0 = scmp.ne.s32.totalorder %s15_s7, %s51_s8  ;;  %p57_p2 = scmp.lt.s32.totalorder %s51_s8, %s51_s8 }
   0x6   :  { %p58_p3 = por %p57_p2, %p56_p1 }
   0x8   :  { %p59_p4 = pnand %p58_p3, %p52_p0 }
   0xa   :  { %62 = shalt.err (!%p59_p4)
}
   0xb   :  { %17 = dma.hbm_to_vmem [thread:$0]  %s106_s0, 128, %s15_s7, [#allocation3]  }
   0xc   :  { %83 = dma.done.wait [#allocation3], 128  }
   0xd   :  { %84 = vsyncadd [#allocation3], 4294967168  ;;  %v21_v0 = vld [vmem:[#allocation2] sm:$0xff]  ;;  %s88_s11 = smov 1   ;;  %s89_s12 = smov [#allocation5]  }
   0xe   :  { %22 = vrot.lane.b32.xlu0 %v21_v0, %s88_s11  ;;  %s31_s13 = sshll.u32 %s89_s12, 4  ;;  %s32_s13 = int_to_ptr.vmem [resolvable:$true] %s31_s13 }
   0xf   :  { %s63_s14 = scalar_lea.vmem %s32_s13, 128  ;;  %p68_p6 = scmp.lt.s32.totalorder %s32_s13, %s32_s13 }
  0x10   :  { %p64_p5 = scmp.ne.s32.totalorder %s32_s13, %s63_s14  ;;  %p69_p7 = scmp.lt.s32.totalorder %s63_s14, %s63_s14 }
  0x12   :  { %p70_p8 = por %p69_p7, %p68_p6 }
  0x14   :  { %p71_p9 = pnand %p70_p8, %p64_p5 }
  0x80   :  { %v23_v1 = vpop.permute.xlu0 %22 }
  0x81   :  { %24 = vst [vmem:[#allocation5] sm:$0xff] %v23_v1 }
  0x82   :  { %74 = shalt.err (!%p71_p9)
}
  0x83   :  { %34 = dma.vmem_to_hbm [thread:$0]  %s32_s13, 128, %s107_s1, [#allocation4]  }
  0x84   :  { %85 = dma.done.wait [#allocation4], 128  }
  0x85   :  { %86 = vsyncadd [#allocation4], 4294967168 }
  0x86   :  { %38 = vsyncpa [#allocation3], 1 }
  0x87   :  { %39 = vsyncpa [#allocation4], 1 }

</bundles_post_ra>
